<compile_context>
chip_gen: v5e
topology: v5e:2x2
jax: 0.10.0
libtpu: 0.0.40
codegen_flags: <defaults>
</compile_context>

<pallas_src>
import jax
import jax.numpy as jnp
from jax import lax
from jax.experimental import pallas as pl

# ---------------- model dimensions (small, consistent with the forward) -------
B      = 2      # batch
S      = 8      # seq_length (question tokens)
VOCAB  = 128    # token vocabulary
EMB    = 32     # word-embedding dim (w_emb output)
QDIM   = 32     # question-encoder output dim (q_emb output)
NOBJ   = 16     # num_objs
VDIM   = 32     # obj_dim
NHID   = 32     # num_hid (attention / q_net / v_net)
MFB_K  = 4      # MFB factor count
MFB_O  = 32     # MFB pooled output dim
MFB_OK = MFB_K * MFB_O   # 128 (lane-dense fused dim)
NCLS   = 16     # number of answer classes


# ------------------------------ Pallas kernel ---------------------------------
def _vqa_mfh_kernel(wmean_ref, v_ref,
                    wenc_ref, benc_ref,
                    wv_ref, bv_ref, wq_ref, bq_ref, wa_ref, ba_ref,
                    wqn_ref, bqn_ref, wvn_ref, bvn_ref,
                    um_ref, vm_ref, pool_ref, wc_ref, bc_ref,
                    out_ref):
    f32 = jnp.float32
    bf16 = jnp.bfloat16

    def mm(x, w):
        # bf16 MXU inputs, f32 accumulation; elementwise math stays f32.
        return jnp.dot(x.astype(bf16), w, preferred_element_type=f32)

    wmean = wmean_ref[...]                                   # [B, EMB]        f32
    v = v_ref[...]                                           # [B, NOBJ, VDIM] f32

    # ---- q_emb surrogate: tanh(Linear(mean-pooled word embeddings))
    q_emb = jnp.tanh(mm(wmean, wenc_ref[...]) + benc_ref[...])          # [B, QDIM]

    # ---- v_att: gated projections -> scores -> softmax over objects (lane axis)
    v2d = v.reshape(B * NOBJ, VDIM)
    v_proj = jnp.maximum(mm(v2d, wv_ref[...]) + bv_ref[...], 0.0)       # [B*NOBJ, NHID]
    v_proj = v_proj.reshape(B, NOBJ, NHID)
    q_proj = jnp.maximum(mm(q_emb, wq_ref[...]) + bq_ref[...], 0.0)     # [B, NHID]
    joint = v_proj * q_proj[:, None, :]                                 # [B, NOBJ, NHID]
    wa = wa_ref[...].reshape(1, 1, NHID)
    att_logits = jnp.sum(joint * wa, axis=-1) + ba_ref[...]             # [B, NOBJ]

    att_logits = att_logits - jnp.max(att_logits, axis=-1, keepdims=True)
    att_exp = jnp.exp(att_logits)
    inv_den = pl.reciprocal(jnp.sum(att_exp, axis=-1, keepdims=True), approx=True)
    att = att_exp * inv_den                                             # [B, NOBJ]

    # ---- v_emb = (att * v).sum(1) as a batched MXU matvec
    v_emb = jnp.einsum('bqk,bkd->bqd',
                       att[:, None, :].astype(bf16), v.astype(bf16),
                       preferred_element_type=f32)[:, 0, :]             # [B, VDIM]

    # ---- q_net / v_net (FCNet = Linear + ReLU)
    q_repr = jnp.maximum(mm(q_emb, wqn_ref[...]) + bqn_ref[...], 0.0)   # [B, NHID]
    v_repr = jnp.maximum(mm(v_emb, wvn_ref[...]) + bvn_ref[...], 0.0)   # [B, NHID]

    # ---- mfh_net surrogate: MFB block + power/L2 normalization + Linear
    fused = mm(q_repr, um_ref[...]) * mm(v_repr, vm_ref[...])           # [B, MFB_OK]
    pooled = mm(fused, pool_ref[...])                                   # [B, MFB_O] (sum-pool over K)
    pw = pooled * lax.rsqrt(jnp.abs(pooled) + 1e-6)                     # signed sqrt
    normed = pw * lax.rsqrt(jnp.sum(pw * pw, axis=-1, keepdims=True) + 1e-6)
    out_ref[...] = mm(normed, wc_ref[...]) + bc_ref[...]                # [B, NCLS]


# ------------------------------ wrapper ----------------------------------------
def vqa_mfh_forward(v, q, labels, params):
    """v: [B, NOBJ, VDIM] f32, q: [B, S] int32 token ids, labels: unused."""
    del labels  # the reference forward never uses labels

    # w_emb: embedding lookup + mean pool over the sequence (glue; a gather has
    # no MXU/VPU benefit inside the kernel).
    w_emb = jnp.take(params["emb"], q, axis=0)          # [B, S, EMB]
    w_mean = jnp.mean(w_emb, axis=1)                    # [B, EMB]

    weight_args = (
        params["wenc"], params["benc"],
        params["wv"], params["bv"], params["wq"], params["bq"],
        params["wa"], params["ba"],
        params["wqn"], params["bqn"], params["wvn"], params["bvn"],
        params["um"], params["vm"], params["pool"],
        params["wc"], params["bc"],
    )

    # Collapsed grid: a single invocation, every array resident whole in VMEM
    # (total footprint ~100 KiB, far under the scoped VMEM limit on all chips).
    return pl.pallas_call(
        _vqa_mfh_kernel,
        out_shape=jax.ShapeDtypeStruct((B, NCLS), jnp.float32),
    )(w_mean, v, *weight_args)


# ------------------------------ params & reference ------------------------------
def init_params(key):
    ks = jax.random.split(key, 20)
    f32 = jnp.float32
    bf16 = jnp.bfloat16

    def w(k, shape, scale=0.1, dtype=bf16):
        return (scale * jax.random.normal(k, shape)).astype(dtype)

    # MFB sum-pooling matrix: groups of MFB_K consecutive factors -> one output.
    pool = (jnp.arange(MFB_OK)[:, None] // MFB_K
            == jnp.arange(MFB_O)[None, :]).astype(bf16)

    return dict(
        emb=w(ks[0], (VOCAB, EMB), dtype=f32),
        # q_emb surrogate encoder
        wenc=w(ks[1], (EMB, QDIM)),   benc=w(ks[2], (1, QDIM), dtype=f32),
        # v_att
        wv=w(ks[3], (VDIM, NHID)),    bv=w(ks[4], (1, NHID), dtype=f32),
        wq=w(ks[5], (QDIM, NHID)),    bq=w(ks[6], (1, NHID), dtype=f32),
        wa=w(ks[7], (1, NHID), dtype=f32), ba=w(ks[8], (1, 1), dtype=f32),
        # q_net / v_net
        wqn=w(ks[9], (QDIM, NHID)),   bqn=w(ks[10], (1, NHID), dtype=f32),
        wvn=w(ks[11], (VDIM, NHID)),  bvn=w(ks[12], (1, NHID), dtype=f32),
        # mfh_net (single MFB block) + classifier
        um=w(ks[13], (NHID, MFB_OK)), vm=w(ks[14], (NHID, MFB_OK)),
        pool=pool,
        wc=w(ks[15], (MFB_O, NCLS)),  bc=w(ks[16], (1, NCLS), dtype=f32),
    )


def vqa_mfh_reference(v, q, params):
    """Pure-JAX reference of the same forward (mirrors the bf16-matmul precision)."""
    f32 = jnp.float32
    bf16 = jnp.bfloat16

    def mm(x, w):
        return jnp.dot(x.astype(bf16), w, preferred_element_type=f32)

    w_emb = jnp.take(params["emb"], q, axis=0)
    w_mean = jnp.mean(w_emb, axis=1)
    q_emb = jnp.tanh(mm(w_mean, params["wenc"]) + params["benc"])
    v2d = v.reshape(B * NOBJ, VDIM)
    v_proj = jax.nn.relu(mm(v2d, params["wv"]) + params["bv"]).reshape(B, NOBJ, NHID)
    q_proj = jax.nn.relu(mm(q_emb, params["wq"]) + params["bq"])
    joint = v_proj * q_proj[:, None, :]
    att_logits = jnp.sum(joint * params["wa"].reshape(1, 1, NHID), axis=-1) + params["ba"]
    att = jax.nn.softmax(att_logits, axis=-1)                     # [B, NOBJ]
    v_emb = jnp.einsum('bk,bkd->bd', att.astype(bf16), v.astype(bf16),
                       preferred_element_type=f32)                # [B, VDIM]
    q_repr = jax.nn.relu(mm(q_emb, params["wqn"]) + params["bqn"])
    v_repr = jax.nn.relu(mm(v_emb, params["wvn"]) + params["bvn"])
    fused = mm(q_repr, params["um"]) * mm(v_repr, params["vm"])
    pooled = mm(fused, params["pool"])
    pw = pooled * lax.rsqrt(jnp.abs(pooled) + 1e-6)
    normed = pw * lax.rsqrt(jnp.sum(pw * pw, axis=-1, keepdims=True) + 1e-6)
    return mm(normed, params["wc"]) + params["bc"]


# ------------------------------ main -------------------------------------------
if __name__ == "__main__":
    key = jax.random.PRNGKey(0)
    kp, kv, kq, kl = jax.random.split(key, 4)

    params = init_params(kp)
    v = jax.random.normal(kv, (B, NOBJ, VDIM), dtype=jnp.float32)
    q = jax.random.randint(kq, (B, S), 0, VOCAB, dtype=jnp.int32)
    labels = jax.random.randint(kl, (B,), 0, NCLS, dtype=jnp.int32)  # unused by forward

    logits = jax.block_until_ready(vqa_mfh_forward(v, q, labels, params))
    ref = vqa_mfh_reference(v, q, params)

    assert logits.shape == (B, NCLS)
    assert bool(jnp.all(jnp.isfinite(logits)))
    max_diff = float(jnp.max(jnp.abs(logits - ref)))
    assert bool(jnp.allclose(logits, ref, rtol=1e-2, atol=1e-2)), f"max abs diff {max_diff}"

    print("KERNEL_OK")
</pallas_src>

<mosaic_0001>
module attributes {stable_mosaic.version = 11 : i64} {
  func.func @_vqa_mfh_kernel(%arg0: memref<2x32xf32, #tpu.memory_space<vmem>>, %arg1: memref<2x16x32xf32, #tpu.memory_space<vmem>>, %arg2: memref<32x32xbf16, #tpu.memory_space<vmem>>, %arg3: memref<1x32xf32, #tpu.memory_space<vmem>>, %arg4: memref<32x32xbf16, #tpu.memory_space<vmem>>, %arg5: memref<1x32xf32, #tpu.memory_space<vmem>>, %arg6: memref<32x32xbf16, #tpu.memory_space<vmem>>, %arg7: memref<1x32xf32, #tpu.memory_space<vmem>>, %arg8: memref<1x32xf32, #tpu.memory_space<vmem>>, %arg9: memref<1x1xf32, #tpu.memory_space<vmem>>, %arg10: memref<32x32xbf16, #tpu.memory_space<vmem>>, %arg11: memref<1x32xf32, #tpu.memory_space<vmem>>, %arg12: memref<32x32xbf16, #tpu.memory_space<vmem>>, %arg13: memref<1x32xf32, #tpu.memory_space<vmem>>, %arg14: memref<32x128xbf16, #tpu.memory_space<vmem>>, %arg15: memref<32x128xbf16, #tpu.memory_space<vmem>>, %arg16: memref<128x32xbf16, #tpu.memory_space<vmem>>, %arg17: memref<32x16xbf16, #tpu.memory_space<vmem>>, %arg18: memref<1x16xf32, #tpu.memory_space<vmem>>, %arg19: memref<2x16xf32, #tpu.memory_space<vmem>>) attributes {dimension_semantics = [], scalar_prefetch = 0 : i64, scratch_operands = 0 : i64, tpu.core_type = #tpu.core_type<tc>} {
    %c0 = arith.constant 0 : index
    %c0_0 = arith.constant 0 : index
    %0 = vector.load %arg0[%c0, %c0_0] : memref<2x32xf32, #tpu.memory_space<vmem>>, vector<2x32xf32>
    %c0_1 = arith.constant 0 : index
    %c0_2 = arith.constant 0 : index
    %c0_3 = arith.constant 0 : index
    %1 = vector.load %arg1[%c0_1, %c0_2, %c0_3] : memref<2x16x32xf32, #tpu.memory_space<vmem>>, vector<2x16x32xf32>
    %c0_4 = arith.constant 0 : index
    %c0_5 = arith.constant 0 : index
    %2 = vector.load %arg2[%c0_4, %c0_5] : memref<32x32xbf16, #tpu.memory_space<vmem>>, vector<32x32xbf16>
    %3 = arith.truncf %0 : vector<2x32xf32> to vector<2x32xbf16>
    %cst = arith.constant dense<0.000000e+00> : vector<2x32xf32>
    %4 = tpu.matmul %3, %2, %cst {dimension_numbers = #tpu.dot_dimension_numbers<[1], [0], [0], [1], [0, 0, 1, 1], [], []>} : vector<2x32xbf16>, vector<32x32xbf16>, vector<2x32xf32> -> vector<2x32xf32>
    %c0_6 = arith.constant 0 : index
    %c0_7 = arith.constant 0 : index
    %5 = vector.load %arg3[%c0_6, %c0_7] : memref<1x32xf32, #tpu.memory_space<vmem>>, vector<1x32xf32>
    %6 = vector.broadcast %5 : vector<1x32xf32> to vector<2x32xf32>
    %7 = arith.addf %4, %6 : vector<2x32xf32>
    %8 = math.tanh %7 : vector<2x32xf32>
    %9 = vector.shape_cast %1 : vector<2x16x32xf32> to vector<32x32xf32>
    %c0_8 = arith.constant 0 : index
    %c0_9 = arith.constant 0 : index
    %10 = vector.load %arg4[%c0_8, %c0_9] : memref<32x32xbf16, #tpu.memory_space<vmem>>, vector<32x32xbf16>
    %11 = arith.truncf %9 : vector<32x32xf32> to vector<32x32xbf16>
    %cst_10 = arith.constant dense<0.000000e+00> : vector<32x32xf32>
    %12 = tpu.matmul %11, %10, %cst_10 {dimension_numbers = #tpu.dot_dimension_numbers<[1], [0], [0], [1], [0, 0, 1, 1], [], []>} : vector<32x32xbf16>, vector<32x32xbf16>, vector<32x32xf32> -> vector<32x32xf32>
    %c0_11 = arith.constant 0 : index
    %c0_12 = arith.constant 0 : index
    %13 = vector.load %arg5[%c0_11, %c0_12] : memref<1x32xf32, #tpu.memory_space<vmem>>, vector<1x32xf32>
    %14 = vector.broadcast %13 : vector<1x32xf32> to vector<32x32xf32>
    %15 = arith.addf %12, %14 : vector<32x32xf32>
    %cst_13 = arith.constant 0.000000e+00 : f32
    %16 = vector.broadcast %cst_13 : f32 to vector<32x32xf32>
    %17 = arith.maximumf %15, %16 : vector<32x32xf32>
    %18 = vector.shape_cast %17 : vector<32x32xf32> to vector<2x16x32xf32>
    %c0_14 = arith.constant 0 : index
    %c0_15 = arith.constant 0 : index
    %19 = vector.load %arg6[%c0_14, %c0_15] : memref<32x32xbf16, #tpu.memory_space<vmem>>, vector<32x32xbf16>
    %20 = arith.truncf %8 : vector<2x32xf32> to vector<2x32xbf16>
    %cst_16 = arith.constant dense<0.000000e+00> : vector<2x32xf32>
    %21 = tpu.matmul %20, %19, %cst_16 {dimension_numbers = #tpu.dot_dimension_numbers<[1], [0], [0], [1], [0, 0, 1, 1], [], []>} : vector<2x32xbf16>, vector<32x32xbf16>, vector<2x32xf32> -> vector<2x32xf32>
    %c0_17 = arith.constant 0 : index
    %c0_18 = arith.constant 0 : index
    %22 = vector.load %arg7[%c0_17, %c0_18] : memref<1x32xf32, #tpu.memory_space<vmem>>, vector<1x32xf32>
    %23 = vector.broadcast %22 : vector<1x32xf32> to vector<2x32xf32>
    %24 = arith.addf %21, %23 : vector<2x32xf32>
    %cst_19 = arith.constant 0.000000e+00 : f32
    %25 = vector.broadcast %cst_19 : f32 to vector<2x32xf32>
    %26 = arith.maximumf %24, %25 : vector<2x32xf32>
    %27 = vector.shape_cast %26 : vector<2x32xf32> to vector<2x1x32xf32>
    %28 = vector.broadcast %27 : vector<2x1x32xf32> to vector<2x16x32xf32>
    %29 = arith.mulf %18, %28 : vector<2x16x32xf32>
    %c0_20 = arith.constant 0 : index
    %c0_21 = arith.constant 0 : index
    %30 = vector.load %arg8[%c0_20, %c0_21] : memref<1x32xf32, #tpu.memory_space<vmem>>, vector<1x32xf32>
    %31 = vector.shape_cast %30 : vector<1x32xf32> to vector<1x1x32xf32>
    %32 = vector.broadcast %31 : vector<1x1x32xf32> to vector<2x16x32xf32>
    %33 = arith.mulf %29, %32 : vector<2x16x32xf32>
    %cst_22 = arith.constant dense<0.000000e+00> : vector<2x16xf32>
    %34 = vector.multi_reduction <add>, %33, %cst_22 [2] : vector<2x16x32xf32> to vector<2x16xf32>
    %c0_23 = arith.constant 0 : index
    %c0_24 = arith.constant 0 : index
    %35 = vector.load %arg9[%c0_23, %c0_24] : memref<1x1xf32, #tpu.memory_space<vmem>>, vector<1x1xf32>
    %36 = vector.broadcast %35 : vector<1x1xf32> to vector<2x16xf32>
    %37 = arith.addf %34, %36 : vector<2x16xf32>
    %cst_25 = arith.constant dense<0xFF800000> : vector<2xf32>
    %38 = vector.multi_reduction <maximumf>, %37, %cst_25 [1] : vector<2x16xf32> to vector<2xf32>
    %39 = vector.shape_cast %38 : vector<2xf32> to vector<2x1xf32>
    %40 = vector.broadcast %39 : vector<2x1xf32> to vector<2x16xf32>
    %41 = arith.subf %37, %40 : vector<2x16xf32>
    %42 = math.exp %41 : vector<2x16xf32>
    %cst_26 = arith.constant dense<0.000000e+00> : vector<2xf32>
    %43 = vector.multi_reduction <add>, %42, %cst_26 [1] : vector<2x16xf32> to vector<2xf32>
    %44 = vector.shape_cast %43 : vector<2xf32> to vector<2x1xf32>
    %45 = tpu.reciprocal %44 {approx = true} : vector<2x1xf32> -> vector<2x1xf32>
    %46 = vector.broadcast %45 : vector<2x1xf32> to vector<2x16xf32>
    %47 = arith.mulf %42, %46 : vector<2x16xf32>
    %48 = vector.shape_cast %47 : vector<2x16xf32> to vector<2x1x16xf32>
    %49 = arith.truncf %48 : vector<2x1x16xf32> to vector<2x1x16xbf16>
    %50 = arith.truncf %1 : vector<2x16x32xf32> to vector<2x16x32xbf16>
    "tpu.trace_start"() <{level = 10 : i32, message = "bqk,bkd->bqd"}> : () -> ()
    %cst_27 = arith.constant dense<0.000000e+00> : vector<2x1x32xf32>
    %51 = tpu.matmul %49, %50, %cst_27 {dimension_numbers = #tpu.dot_dimension_numbers<[2], [1], [1], [2], [0, 0, 0, 1, 1, 2], [0], [0]>} : vector<2x1x16xbf16>, vector<2x16x32xbf16>, vector<2x1x32xf32> -> vector<2x1x32xf32>
    "tpu.trace_stop"() : () -> ()
    %52 = vector.shape_cast %51 : vector<2x1x32xf32> to vector<2x32xf32>
    %c0_28 = arith.constant 0 : index
    %c0_29 = arith.constant 0 : index
    %53 = vector.load %arg10[%c0_28, %c0_29] : memref<32x32xbf16, #tpu.memory_space<vmem>>, vector<32x32xbf16>
    %54 = arith.truncf %8 : vector<2x32xf32> to vector<2x32xbf16>
    %cst_30 = arith.constant dense<0.000000e+00> : vector<2x32xf32>
    %55 = tpu.matmul %54, %53, %cst_30 {dimension_numbers = #tpu.dot_dimension_numbers<[1], [0], [0], [1], [0, 0, 1, 1], [], []>} : vector<2x32xbf16>, vector<32x32xbf16>, vector<2x32xf32> -> vector<2x32xf32>
    %c0_31 = arith.constant 0 : index
    %c0_32 = arith.constant 0 : index
    %56 = vector.load %arg11[%c0_31, %c0_32] : memref<1x32xf32, #tpu.memory_space<vmem>>, vector<1x32xf32>
    %57 = vector.broadcast %56 : vector<1x32xf32> to vector<2x32xf32>
    %58 = arith.addf %55, %57 : vector<2x32xf32>
    %cst_33 = arith.constant 0.000000e+00 : f32
    %59 = vector.broadcast %cst_33 : f32 to vector<2x32xf32>
    %60 = arith.maximumf %58, %59 : vector<2x32xf32>
    %c0_34 = arith.constant 0 : index
    %c0_35 = arith.constant 0 : index
    %61 = vector.load %arg12[%c0_34, %c0_35] : memref<32x32xbf16, #tpu.memory_space<vmem>>, vector<32x32xbf16>
    %62 = arith.truncf %52 : vector<2x32xf32> to vector<2x32xbf16>
    %cst_36 = arith.constant dense<0.000000e+00> : vector<2x32xf32>
    %63 = tpu.matmul %62, %61, %cst_36 {dimension_numbers = #tpu.dot_dimension_numbers<[1], [0], [0], [1], [0, 0, 1, 1], [], []>} : vector<2x32xbf16>, vector<32x32xbf16>, vector<2x32xf32> -> vector<2x32xf32>
    %c0_37 = arith.constant 0 : index
    %c0_38 = arith.constant 0 : index
    %64 = vector.load %arg13[%c0_37, %c0_38] : memref<1x32xf32, #tpu.memory_space<vmem>>, vector<1x32xf32>
    %65 = vector.broadcast %64 : vector<1x32xf32> to vector<2x32xf32>
    %66 = arith.addf %63, %65 : vector<2x32xf32>
    %cst_39 = arith.constant 0.000000e+00 : f32
    %67 = vector.broadcast %cst_39 : f32 to vector<2x32xf32>
    %68 = arith.maximumf %66, %67 : vector<2x32xf32>
    %c0_40 = arith.constant 0 : index
    %c0_41 = arith.constant 0 : index
    %69 = vector.load %arg14[%c0_40, %c0_41] : memref<32x128xbf16, #tpu.memory_space<vmem>>, vector<32x128xbf16>
    %70 = arith.truncf %60 : vector<2x32xf32> to vector<2x32xbf16>
    %cst_42 = arith.constant dense<0.000000e+00> : vector<2x128xf32>
    %71 = tpu.matmul %70, %69, %cst_42 {dimension_numbers = #tpu.dot_dimension_numbers<[1], [0], [0], [1], [0, 0, 1, 1], [], []>} : vector<2x32xbf16>, vector<32x128xbf16>, vector<2x128xf32> -> vector<2x128xf32>
    %c0_43 = arith.constant 0 : index
    %c0_44 = arith.constant 0 : index
    %72 = vector.load %arg15[%c0_43, %c0_44] : memref<32x128xbf16, #tpu.memory_space<vmem>>, vector<32x128xbf16>
    %73 = arith.truncf %68 : vector<2x32xf32> to vector<2x32xbf16>
    %cst_45 = arith.constant dense<0.000000e+00> : vector<2x128xf32>
    %74 = tpu.matmul %73, %72, %cst_45 {dimension_numbers = #tpu.dot_dimension_numbers<[1], [0], [0], [1], [0, 0, 1, 1], [], []>} : vector<2x32xbf16>, vector<32x128xbf16>, vector<2x128xf32> -> vector<2x128xf32>
    %75 = arith.mulf %71, %74 : vector<2x128xf32>
    %c0_46 = arith.constant 0 : index
    %c0_47 = arith.constant 0 : index
    %76 = vector.load %arg16[%c0_46, %c0_47] : memref<128x32xbf16, #tpu.memory_space<vmem>>, vector<128x32xbf16>
    %77 = arith.truncf %75 : vector<2x128xf32> to vector<2x128xbf16>
    %cst_48 = arith.constant dense<0.000000e+00> : vector<2x32xf32>
    %78 = tpu.matmul %77, %76, %cst_48 {dimension_numbers = #tpu.dot_dimension_numbers<[1], [0], [0], [1], [0, 0, 1, 1], [], []>} : vector<2x128xbf16>, vector<128x32xbf16>, vector<2x32xf32> -> vector<2x32xf32>
    %79 = math.absf %78 : vector<2x32xf32>
    %cst_49 = arith.constant 9.99999997E-7 : f32
    %80 = vector.broadcast %cst_49 : f32 to vector<2x32xf32>
    %81 = arith.addf %79, %80 : vector<2x32xf32>
    %82 = math.rsqrt %81 : vector<2x32xf32>
    %83 = arith.mulf %78, %82 : vector<2x32xf32>
    %84 = arith.mulf %83, %83 : vector<2x32xf32>
    %cst_50 = arith.constant dense<0.000000e+00> : vector<2xf32>
    %85 = vector.multi_reduction <add>, %84, %cst_50 [1] : vector<2x32xf32> to vector<2xf32>
    %86 = vector.shape_cast %85 : vector<2xf32> to vector<2x1xf32>
    %cst_51 = arith.constant 9.99999997E-7 : f32
    %87 = vector.broadcast %cst_51 : f32 to vector<2x1xf32>
    %88 = arith.addf %86, %87 : vector<2x1xf32>
    %89 = math.rsqrt %88 : vector<2x1xf32>
    %90 = vector.broadcast %89 : vector<2x1xf32> to vector<2x32xf32>
    %91 = arith.mulf %83, %90 : vector<2x32xf32>
    %c0_52 = arith.constant 0 : index
    %c0_53 = arith.constant 0 : index
    %92 = vector.load %arg17[%c0_52, %c0_53] : memref<32x16xbf16, #tpu.memory_space<vmem>>, vector<32x16xbf16>
    %93 = arith.truncf %91 : vector<2x32xf32> to vector<2x32xbf16>
    %cst_54 = arith.constant dense<0.000000e+00> : vector<2x16xf32>
    %94 = tpu.matmul %93, %92, %cst_54 {dimension_numbers = #tpu.dot_dimension_numbers<[1], [0], [0], [1], [0, 0, 1, 1], [], []>} : vector<2x32xbf16>, vector<32x16xbf16>, vector<2x16xf32> -> vector<2x16xf32>
    %c0_55 = arith.constant 0 : index
    %c0_56 = arith.constant 0 : index
    %95 = vector.load %arg18[%c0_55, %c0_56] : memref<1x16xf32, #tpu.memory_space<vmem>>, vector<1x16xf32>
    %96 = vector.broadcast %95 : vector<1x16xf32> to vector<2x16xf32>
    %97 = arith.addf %94, %96 : vector<2x16xf32>
    %c0_57 = arith.constant 0 : index
    %c0_58 = arith.constant 0 : index
    %98 = vector.load %arg19[%c0_57, %c0_58] : memref<2x16xf32, #tpu.memory_space<vmem>>, vector<2x16xf32>
    tpu.vector_store %arg19[%c0_57, %c0_58], %97 {strides = array<i32>} : memref<2x16xf32, #tpu.memory_space<vmem>>, vector<2x16xf32>,
    return
  }
}

</mosaic_0001>

<bundles_post_ra>
// kernel: tpu_custom_call.1
= control target key start
LH: loop header
LB: loop body
LE: loop exit
PB: predicated region body
PF: predicated region fallthrough
CT: control target
= control target key end

     0   :  { %s1597_s0 = inlined_call_operand.hbm [shape: f32[2,32], index: 0, kind: input, shape index: {}]   ;;  %s1598_s1 = inlined_call_operand.vmem [shape: f32[2,16,32], index: 1, kind: input, shape index: {}]   ;;  %s1599_s2 = inlined_call_operand.vmem [shape: bf16[32,32], index: 2, kind: input, shape index: {}]   ;;  %s1600_s3 = inlined_call_operand.hbm [shape: f32[1,32], index: 3, kind: input, shape index: {}]   ;;  %s1601_s4 = inlined_call_operand.vmem [shape: bf16[32,32], index: 4, kind: input, shape index: {}]   ;;  %s1602_s5 = inlined_call_operand.hbm [shape: f32[1,32], index: 5, kind: input, shape index: {}]   ;;  %s1603_s6 = inlined_call_operand.vmem [shape: bf16[32,32], index: 6, kind: input, shape index: {}]   ;;  %s1604_s7 = inlined_call_operand.hbm [shape: f32[1,32], index: 7, kind: input, shape index: {}]   ;;  %s1605_s8 = inlined_call_operand.hbm [shape: f32[1,32], index: 8, kind: input, shape index: {}]   ;;  %s1606_s9 = inlined_call_operand.<no memory space> [shape: f32[1,1], index: 9, kind: input, shape index: {}]   ;;  %s1607_s10 = inlined_call_operand.vmem [shape: bf16[32,32], index: 10, kind: input, shape index: {}]   ;;  %s1608_s11 = inlined_call_operand.hbm [shape: f32[1,32], index: 11, kind: input, shape index: {}]   ;;  %s1609_s12 = inlined_call_operand.hbm [shape: bf16[32,32], index: 12, kind: input, shape index: {}]   ;;  %s1610_s13 = inlined_call_operand.hbm [shape: f32[1,32], index: 13, kind: input, shape index: {}]   ;;  %s1611_s14 = inlined_call_operand.hbm [shape: bf16[32,128], index: 14, kind: input, shape index: {}]   ;;  %s1612_s15 = inlined_call_operand.hbm [shape: bf16[32,128], index: 15, kind: input, shape index: {}]   ;;  %s1613_s16 = inlined_call_operand.vmem [shape: bf16[128,32], index: 16, kind: input, shape index: {}]   ;;  %s1614_s17 = inlined_call_operand.vmem [shape: bf16[32,16], index: 17, kind: input, shape index: {}]   ;;  %s1615_s18 = inlined_call_operand.vmem [shape: f32[1,16], index: 18, kind: input, shape index: {}]   ;;  %s1616_s19 = inlined_call_operand.hbm [shape: f32[2,16], index: 19, kind: output, shape index: {}]  }
   0x1   :  { %1619 = sst [smem:[#allocation28_spill]] %s1597_s0  ;;  %v24_v0 = vstv %s1606_s9 }
   0x2   :  { %1620 = sst [smem:[#allocation29_spill]] %s1598_s1  ;;  %25 = vst [vmem:[#allocation2] sm:$0x1] %v24_v0 }
   0x3   :  { %1621 = sst [smem:[#allocation30_spill]] %s1599_s2 }
   0x4   :  { %1622 = sst [smem:[#allocation31_spill]] %s1600_s3 }
   0x5   :  { %26 = vsyncpa [#allocation4], 0 }
   0x6   :  { %27 = vsyncpa [#allocation7], 0 }
   0x7   :  { %28 = vsyncpa [#allocation10], 0 }
   0x8   :  { %29 = vsyncpa [#allocation13], 0 }
   0x9   :  { %30 = vsyncpa [#allocation16], 0 }
   0xa   :  { %31 = vsyncpa [#allocation19], 0  ;;  %s1623_s1 = sld [smem:[#allocation31_spill]] }
  0x10   :  { %s53_s22 = sshll.u32 %s1623_s1, 4  ;;  %s54_s22 = int_to_ptr.hbm [resolvable:$true] %s53_s22 }
  0x11   :  { %32 = vsyncpa [#allocation5], 0  ;;  %s1313_s2 = smov [#allocation6]   ;;  %s79_s9 = sshll.u32 %s1604_s7, 4  ;;  %s80_s9 = int_to_ptr.hbm [resolvable:$true] %s79_s9 }
  0x12   :  { %s55_s23 = sshll.u32 %s1313_s2, 4  ;;  %s1314_s3 = smov [#allocation9]   ;;  %s56_s23 = int_to_ptr.vmem [resolvable:$true] %s55_s23 }
  0x13   :  { %58 = dma.hbm_to_vmem [thread:$0]  %s54_s22, 16, %s56_s23, [#allocation7]  }
  0x14   :  { %s81_s26 = sshll.u32 %s1314_s3, 4  ;;  %s105_s29 = sshll.u32 %s1608_s11, 4  ;;  %s82_s26 = int_to_ptr.vmem [resolvable:$true] %s81_s26  ;;  %s106_s29 = int_to_ptr.hbm [resolvable:$true] %s105_s29 }
  0x15   :  { %84 = dma.hbm_to_vmem [thread:$0]  %s80_s9, 16, %s82_s26, [#allocation10]  }
  0x16   :  { %s129_s20 = sshll.u32 %s1610_s13, 4  ;;  %s1315_s21 = smov [#allocation12]   ;;  %s130_s20 = int_to_ptr.hbm [resolvable:$true] %s129_s20 }
  0x17   :  { %s107_s1 = sshll.u32 %s1315_s21, 4  ;;  %s1316_s7 = smov [#allocation15]   ;;  %s108_s1 = int_to_ptr.vmem [resolvable:$true] %s107_s1 }
  0x18   :  { %110 = dma.hbm_to_vmem [thread:$0]  %s106_s29, 16, %s108_s1, [#allocation13]  }
  0x19   :  { %s131_s22 = sshll.u32 %s1316_s7, 4  ;;  %s1624_s24 = sld [smem:[#allocation28_spill]]  ;;  %s132_s22 = int_to_ptr.vmem [resolvable:$true] %s131_s22 }
  0x1a   :  { %134 = dma.hbm_to_vmem [thread:$0]  %s130_s20, 16, %s132_s22, [#allocation16]  }
  0x1b   :  { %s66_s3 = sshll.u32 %s1602_s5, 4  ;;  %s1317_s26 = smov [#allocation3]   ;;  %s67_s3 = int_to_ptr.hbm [resolvable:$true] %s66_s3 }
  0x1c   :  { %s40_s13 = sshll.u32 %s1317_s26, 4  ;;  %s1318_s27 = smov [#allocation8]   ;;  %s41_s13 = int_to_ptr.vmem [resolvable:$true] %s40_s13 }
  0x1d   :  { %s68_s28 = sshll.u32 %s1318_s27, 4  ;;  %s90_s30 = sshll.u32 %s1605_s8, 4  ;;  %s69_s28 = int_to_ptr.vmem [resolvable:$true] %s68_s28  ;;  %s91_s30 = int_to_ptr.hbm [resolvable:$true] %s90_s30 }
  0x1e   :  { %71 = dma.hbm_to_vmem [thread:$0]  %s67_s3, 16, %s69_s28, [#allocation7]  }
  0x1f   :  { %s38_s25 = sshll.u32 %s1624_s24, 4  ;;  %s115_s1 = sshll.u32 %s1609_s12, 4  ;;  %s39_s25 = int_to_ptr.hbm [resolvable:$true] %s38_s25  ;;  %s116_s1 = int_to_ptr.hbm [resolvable:$true] %s115_s1 }
  0x20   :  { %43 = dma.hbm_to_vmem [thread:$0]  %s39_s25, 32, %s41_s13, [#allocation4]  }
  0x21   :  { %s1319_s7 = smov [#allocation11]   ;;  %s1320_s22 = smov [#allocation14]  }
  0x22   :  { %s92_s5 = sshll.u32 %s1319_s7, 4  ;;  %s117_s2 = sshll.u32 %s1320_s22, 4  ;;  %s93_s5 = int_to_ptr.vmem [resolvable:$true] %s92_s5  ;;  %s118_s2 = int_to_ptr.vmem [resolvable:$true] %s117_s2 }
  0x23   :  { %95 = dma.hbm_to_vmem [thread:$0]  %s91_s30, 16, %s93_s5, [#allocation10]  }
  0x24   :  { %s1321_s23 = smov 64   ;;  %s1322_s24 = smov 4  }
  0x25   :  { %123 = dma.hbm_to_vmem [thread:$0]  %s116_s1, 256, %s118_s2, [#allocation13], %s1321_s23, %s1321_s23, %s1322_s24  }
  0x26   :  { %s139_s11 = sshll.u32 %s1611_s14, 4  ;;  %s1323_s9 = smov [#allocation17]   ;;  %s140_s11 = int_to_ptr.hbm [resolvable:$true] %s139_s11 }
  0x27   :  { %s141_s3 = sshll.u32 %s1323_s9, 4  ;;  %s152_s13 = sshll.u32 %s1612_s15, 4  ;;  %s142_s3 = int_to_ptr.vmem [resolvable:$true] %s141_s3  ;;  %s153_s13 = int_to_ptr.hbm [resolvable:$true] %s152_s13 }
  0x28   :  { %147 = dma.hbm_to_vmem [thread:$0]  %s140_s11, 256, %s142_s3, [#allocation16], %s1321_s23, %s1321_s23, %s1322_s24  }
  0x29   :  { %s1324_s27 = smov [#allocation18]  }
  0x2a   :  { %s154_s28 = sshll.u32 %s1324_s27, 4  ;;  %s155_s28 = int_to_ptr.vmem [resolvable:$true] %s154_s28 }
  0x2b   :  { %160 = dma.hbm_to_vmem [thread:$0]  %s153_s13, 256, %s155_s28, [#allocation19], %s1321_s23, %s1321_s23, %s1322_s24  }
  0x2c   :  { %1299 = dma.done.wait [#allocation4], 32  }
  0x2d   :  { %1300 = vsyncadd [#allocation4], 4294967264 }
  0x2e   :  { %1301 = dma.done.wait [#allocation7], 32  }
  0x2f   :  { %1302 = vsyncadd [#allocation7], 4294967264 }
  0x30   :  { %1303 = dma.done.wait [#allocation10], 32  }
  0x31   :  { %1304 = vsyncadd [#allocation10], 4294967264 }
  0x32   :  { %1305 = dma.done.wait [#allocation13], 272  }
  0x33   :  { %1306 = vsyncadd [#allocation13], 4294967024 }
  0x34   :  { %1307 = dma.done.wait [#allocation16], 272  }
  0x35   :  { %1308 = vsyncadd [#allocation16], 4294967024 }
  0x36   :  { %1309 = dma.done.wait [#allocation19], 256  }
  0x37   :  { %1310 = vsyncadd [#allocation19], 4294967040  ;;  %s1625_s29 = sld [smem:[#allocation30_spill]]  ;;  %v208_v3 = vld [vmem:[#allocation3] sm:$0x3]  ;;  %v973_v4 = vld [vmem:[%s1601_s4 + $0x8] sm:$0xff]  ;;  %v386_v62 = vlaneseq }
  0x38   :  { %v972_v5 = vld [vmem:[%s1601_s4] sm:$0xff]  ;;  %s1626_s2 = sld [smem:[#allocation29_spill]]  ;;  %286 = vmatpush.bf16.msra.mxu1 %v973_v4  ;;  %v217_v8 = vpack.c.bf16 %v208_v3, %v208_v3  ;;  %vm234_vm0 = vcmask 261120   ;;  %v975_v10 = vld [vmem:[%s1603_s6 + $0x8] sm:$0xff]  ;;  %v1325_v26 = vmov 0   ;;  %vm391_vm1 = vcmask 130112  }
  0x39   :  { %v977_v11 = vld [vmem:[%s1607_s10 + $0x8] sm:$0xff]  ;;  %333 = vmatpush.bf16.msra.mxu2 %v975_v10  ;;  %v974_v12 = vld [vmem:[%s1603_s6] sm:$0xff]  ;;  %1008 = vset.pattern.permute.xlu2 %v1325_v26  ;;  %v1519_v0 = vand.u32 127, %v386_v62  ;;  %vm396_vm2 = vcmask 1041409   ;;  %vm399_vm3 = vcmask 123904   ;;  %vm488_vm4 = vcmask 130048  }
  0x3a   :  { %v976_v13 = vld [vmem:[%s1607_s10] sm:$0xff]  ;;  %1010 = vset.pattern.permute.xlu1 %v1325_v26  ;;  %1009 = vset.pattern.permute.xlu0 %v1325_v26  ;;  %v1015_v44 = vld [vmem:[#allocation11] ss:$0 sm:$0xff]  ;;  %vm783_vm8 = vcmask 254976   ;;  %s1326_s3 = smov [#allocation20]   ;;  %s844_s27 = sshll.u32 %s1616_s19, 4  ;;  %s845_s27 = int_to_ptr.hbm [resolvable:$true] %s844_s27 }
  0x3b   :  { %v1011_v17 = vld [vmem:[#allocation6] ss:$0 sm:$0xff]  ;;  %v1016_v25 = vld [vmem:[#allocation2] ss:$0 sm:$0xff]  ;;  %v1012_v29 = vld [vmem:[#allocation8] ss:$0 sm:$0xff] }
  0x3c   :  { %287 = vmatpush.bf16.msra.mxu1 %v972_v5  ;;  %375 = vperm.xlu2 %1008, %v1016_v25   ;;  %v1014_v30 = vld [vmem:[#allocation9] ss:$0 sm:$0xff]  ;;  %s842_s12 = sshll.u32 %s1326_s3, 4  ;;  %s843_s12 = int_to_ptr.vmem [resolvable:$true] %s842_s12 }
  0x3d   :  { %v971_v1 = vld [vmem:[%s1625_s29 + $0x8] sm:$0xff]  ;;  %v970_v2 = vld [vmem:[%s1625_s29] sm:$0xff]  ;;  %334 = vmatpush.bf16.msra.mxu2 %v974_v12 }
  0x3e   :  { %244 = vmatpush.bf16.msra.mxu0 %v971_v1  ;;  %v1475_v6 = vld [vmem:[%s1626_s2] sm:$0xff]  ;;  %v1480_v7 = vld [vmem:[%s1626_s2 + $0x8] sm:$0xff]  ;;  %v1501_v14 = vld [vmem:[%s1626_s2 + $0x10] sm:$0xff] }
  0x3f   :  { %v256_v9 = vpack.c.bf16 %v1480_v7, %v1475_v6  ;;  %v1506_v15 = vld [vmem:[%s1626_s2 + $0x18] sm:$0xff] }
  0x40   :  { %v257_v16 = vpack.c.bf16 %v1506_v15, %v1501_v14 }
  0x41   :  { %876 = vmatmul.msk.bf16.vlgmr.msra.gmra.mxu1 %vm234_vm0, %v256_v9 }
  0x42   :  { %245 = vmatpush.bf16.msra.mxu0 %v970_v2  ;;  %v1522_v2 = vadd.s32 4294967288, %v1519_v0 }
  0x45   :  { %867 = vmatmul.msk.bf16.vlgmr.msra.gmra.mxu0 %vm234_vm0, %v217_v8 }
  0x46   :  { %570 = vmatpush.bf16.msrb.mxu0 %v977_v11 }
  0x4a   :  { %571 = vmatpush.bf16.msrb.mxu0 %v976_v13 }
  0x51   :  { %877 = vmatmul.msk.bf16.gmra.mxu1 %vm234_vm0, %v257_v16 }
  0x96   :  { %v376_v1 = vpop.permute.xlu2 %375 }
  0xbe   :  { %v289_v23 = vpop.f32.mrf.mxu1 }
  0xbf   :  { %v290_v31 = vadd.f32 %v1012_v29, %v289_v23 }
  0xc1   :  { %v299_v38 = vmax.f32 %v290_v31, 0.0 }
  0xc2   :  { %v247_v18 = vpop.f32.mrf.mxu0 }
  0xc3   :  { %v248_v19 = vadd.f32 %v1011_v17, %v247_v18 }
  0xc5   :  { %1019 = vtanh.f32 %v248_v19 }
  0xc6   :  { %v291_v24 = vpop.f32.mrf.mxu1 }
  0xc7   :  { %v292_v39 = vadd.f32 %v1012_v29, %v291_v24 }
  0xc9   :  { %v300_v48 = vmax.f32 %v292_v39, 0.0 }
  0xca   :  { %v249_v20 = vpop.f32.mrf.mxu0 }
  0xcb   :  { %v1020_v21 = vpop.eup %1019 }
  0xcc   :  { %v307_v22 = vpack.c.bf16 %v1020_v21, %v1020_v21 }
  0xce   :  { %886 = vmatmul.msk.bf16.vlgmr.msra.gmra.mxu2 %vm234_vm0, %v307_v22  ;;  %901 = vmatmul.msk.bf16.vlgmr.msrb.gmra.mxu0 %vm234_vm0, %v307_v22  ;;  %v294_v27 = vpop.f32.mrf.mxu1 }
  0xcf   :  { %v295_v33 = vadd.f32 %v1012_v29, %v294_v27 }
  0xd1   :  { %v301_v40 = vmax.f32 %v295_v33, 0.0 }
  0xd6   :  { %v296_v36 = vpop.f32.mrf.mxu1 }
  0xd7   :  { %v297_v43 = vadd.f32 %v1012_v29, %v296_v36 }
  0xd9   :  { %v302_v49 = vmax.f32 %v297_v43, 0.0 }
 0x14b   :  { %v1513_v28 = vpop.f32.mrf.mxu0 }
 0x151   :  { %v336_v32 = vpop.f32.mrf.mxu2 }
 0x152   :  { %v337_v34 = vadd.f32 %v1014_v30, %v336_v32 }
 0x153   :  { %v575_v35 = vpop.f32.mrf.mxu0 }
 0x154   :  { %v340_v37 = vmax.f32 %v337_v34, 0.0 }
 0x156   :  { %v342_v41 = vrot.slane %v340_v37, 1  ;;  %v343_v42 = vperm.slane %v340_v37, 0 }
 0x158   :  { %v344_v45 = vperm.slane %v342_v41, 0  ;;  %v347_v46 = vmul.f32 %v343_v42, %v299_v38  ;;  %v348_v54 = vmul.f32 %v343_v42, %v300_v48 }
 0x159   :  { %v338_v47 = vpop.f32.mrf.mxu2 }
 0x15a   :  { %v355_v50 = vmul.f32 %v1015_v44, %v347_v46  ;;  %v349_v51 = vmul.f32 %v344_v45, %v301_v40  ;;  %v350_v55 = vmul.f32 %v344_v45, %v302_v49  ;;  %v356_v57 = vmul.f32 %v1015_v44, %v348_v54 }
 0x15c   :  { %v359_v52 = vsel %vm234_vm0, %v355_v50, 0.0  ;;  %v357_v53 = vmul.f32 %v1015_v44, %v349_v51  ;;  %v358_v58 = vmul.f32 %v1015_v44, %v350_v55  ;;  %v362_v59 = vsel %vm234_vm0, %v356_v57, 0.0 }
 0x15d   :  { %360 = vadd.xlane.f32.xlu0 %v359_v52 }
 0x15e   :  { %v365_v56 = vsel %vm234_vm0, %v357_v53, 0.0  ;;  %v368_v60 = vsel %vm234_vm0, %v358_v58, 0.0 }
 0x15f   :  { %366 = vadd.xlane.f32.xlu1 %v365_v56 }
 0x165   :  { %363 = vadd.xlane.f32.xlu0 %v362_v59 }
 0x167   :  { %369 = vadd.xlane.f32.xlu1 %v368_v60 }
 0x1d0   :  { %v361_v61 = vpop.xlane.xlu0 %360 }
 0x1d1   :  { %v378_v4 = vadd.f32 %v376_v1, %v361_v61 }
 0x1d2   :  { %v367_v63 = vpop.xlane.xlu1 %366 }
 0x1d3   :  { %v380_v5 = vadd.f32 %v376_v1, %v367_v63  ;;  %v388_v12 = vperm.slane %v378_v4, %v1519_v0 }
 0x1d5   :  { %v393_v13 = vperm.slane %v380_v5, %v1519_v0 }
 0x1d8   :  { %v364_v3 = vpop.xlane.xlu0 %363 }
 0x1d9   :  { %v379_v8 = vadd.f32 %v376_v1, %v364_v3 }
 0x1da   :  { %v370_v9 = vpop.xlane.xlu1 %369 }
 0x1db   :  { %v390_v10 = vperm.slane %v379_v8, %v1522_v2  ;;  %v381_v11 = vadd.f32 %v376_v1, %v370_v9  ;;  %v461_v9 = vpack.c.bf16 %v1475_v6, %v1475_v6 }
 0x1dd   :  { %v394_v16 = vperm.slane %v381_v11, %v1522_v2  ;;  %v392_v17 = vsel %vm391_vm1, %v390_v10, %v388_v12  ;;  %v462_v10 = vpack.c.bf16 %v1480_v7, %v1480_v7 }
 0x1df   :  { %v395_v18 = vsel %vm391_vm1, %v394_v16, %v393_v13  ;;  %v485_v12 = vunpack.c.l.b16 %v462_v10  ;;  %v463_v16 = vpack.c.bf16 %v1501_v14, %v1501_v14  ;;  %v980_v14 = vld [vmem:[#allocation17] sm:$0xff] }
 0x1e0   :  { %v397_v19 = vsel %vm396_vm2, %v395_v18, %v392_v17  ;;  %v464_v17 = vpack.c.bf16 %v1506_v15, %v1506_v15 }
 0x1e1   :  { %v400_v20 = vsel %vm399_vm3, %v397_v19, -inf  ;;  %v524_v18 = vunpack.c.l.b16 %v463_v16 }
 0x1e2   :  { %401 = vmax.xlane.f32.xlu2 %v400_v20  ;;  %v525_v19 = vunpack.c.l.b16 %v464_v17 }
 0x1e4   :  { %v526_v20 = vpack.c.b16 %v525_v19, %v524_v18 }
 0x255   :  { %v402_v21 = vpop.xlane.xlu2 %401 }
 0x256   :  { %v404_v22 = vperm.slane %v402_v21, 0  ;;  %v405_v25 = vperm.slane %v402_v21, 1 }
 0x258   :  { %v408_v23 = vsub.f32 %v378_v4, %v404_v22  ;;  %v409_v24 = vsub.f32 %v379_v8, %v404_v22  ;;  %v410_v29 = vsub.f32 %v380_v5, %v405_v25  ;;  %v411_v33 = vsub.f32 %v381_v11, %v405_v25 }
 0x259   :  { %v484_v11 = vunpack.c.l.b16 %v461_v9 }
 0x25a   :  { %v412_v26 = vmul.f32 1.442695, %v408_v23  ;;  %v414_v27 = vmul.f32 1.442695, %v409_v24  ;;  %v416_v30 = vmul.f32 1.442695, %v410_v29 }
 0x25b   :  { %v418_v34 = vmul.f32 1.442695, %v411_v33  ;;  %v486_v13 = vpack.c.b16 %v485_v12, %v484_v11  ;;  %v981_v24 = vld [vmem:[#allocation17 + $0x8] sm:$0xff] }
 0x25c   :  { %1021 = vpow2.f32 %v412_v26 }
 0x25d   :  { %1023 = vpow2.f32 %v414_v27  ;;  %499 = vmatpush.bf16.msra.mxu3 %v486_v13 }
 0x25e   :  { %1025 = vpow2.f32 %v416_v30 }
 0x25f   :  { %1027 = vpow2.f32 %v418_v34 }
 0x261   :  { %538 = vmatpush.bf16.msrb.mxu3 %v526_v20 }
 0x262   :  { %v1022_v31 = vpop.eup %1021 }
 0x263   :  { %v1024_v32 = vpop.eup %1023  ;;  %425 = vperm.xlu0 %1009, %v1022_v31  }
 0x264   :  { %428 = vperm.xlu1 %1010, %v1024_v32   ;;  %v1026_v35 = vpop.eup %1025 }
 0x265   :  { %v1028_v36 = vpop.eup %1027 }
 0x26c   :  { %431 = vperm.xlu1 %1010, %v1026_v35  }
 0x274   :  { %434 = vperm.xlu1 %1010, %v1028_v36  }
 0x2d5   :  { %v426_v39 = vpop.permute.xlu0 %425 }
 0x2d6   :  { %v429_v37 = vpop.permute.xlu1 %428  ;;  %v436_v41 = vperm.slane %v426_v39, %v1519_v0 }
 0x2d7   :  { %v437_v40 = vperm.slane %v429_v37, %v1522_v2  ;;  %v978_v37 = vld [vmem:[#allocation14] sm:$0xff] }
 0x2d9   :  { %v438_v45 = vsel %vm391_vm1, %v437_v40, %v436_v41 }
 0x2de   :  { %v432_v38 = vpop.permute.xlu1 %431 }
 0x2df   :  { %v439_v43 = vperm.slane %v432_v38, %v1519_v0 }
 0x2e6   :  { %v435_v42 = vpop.permute.xlu1 %434 }
 0x2e7   :  { %v440_v44 = vperm.slane %v435_v42, %v1522_v2 }
 0x2e9   :  { %v441_v46 = vsel %vm391_vm1, %v440_v44, %v439_v43 }
 0x2ea   :  { %v442_v47 = vsel %vm396_vm2, %v441_v46, %v438_v45 }
 0x2eb   :  { %v444_v48 = vsel %vm399_vm3, %v442_v47, 0.0 }
 0x2ec   :  { %445 = vadd.xlane.f32.xlu2 %v444_v48 }
 0x35f   :  { %v446_v49 = vpop.xlane.xlu2 %445 }
 0x360   :  { %1029 = vrcp.f32 %v446_v49 }
 0x366   :  { %v1030_v50 = vpop.eup %1029 }
 0x367   :  { %v450_v51 = vperm.slane %v1030_v50, 1  ;;  %v449_v52 = vperm.slane %v1030_v50, 0  ;;  %v991_v50 = vld [vmem:[%s1613_s16 + $0x38] sm:$0xff] }
 0x368   :  { %756 = vmatpush.bf16.msrb.mxu1 %v991_v50 }
 0x369   :  { %v455_v53 = vmul.f32 %v1026_v35, %v450_v51  ;;  %v454_v54 = vmul.f32 %v1024_v32, %v449_v52  ;;  %v453_v55 = vmul.f32 %v1022_v31, %v449_v52  ;;  %v456_v59 = vmul.f32 %v1028_v36, %v450_v51  ;;  %v1013_v32 = vld [vmem:[#allocation12] ss:$0 sm:$0xff]  ;;  %v979_v36 = vld [vmem:[#allocation14 + $0x8] sm:$0xff] }
 0x36a   :  { %v574_v33 = vadd.f32 %v1013_v32, %v1513_v28  ;;  %616 = vmatpush.bf16.msrb.mxu2 %v979_v36  ;;  %v990_v51 = vld [vmem:[%s1613_s16 + $0x30] sm:$0xff]  ;;  %v989_v52 = vld [vmem:[%s1613_s16 + $0x28] sm:$0xff] }
 0x36b   :  { %v459_v56 = vpack.c.bf16 %v455_v53, %v455_v53  ;;  %v458_v57 = vpack.c.bf16 %v454_v54, %v454_v54  ;;  %v457_v58 = vpack.c.bf16 %v453_v55, %v453_v55  ;;  %v460_v4 = vpack.c.bf16 %v456_v59, %v456_v59  ;;  %v988_v53 = vld [vmem:[%s1613_s16 + $0x20] sm:$0xff]  ;;  %v987_v54 = vld [vmem:[%s1613_s16 + $0x18] sm:$0xff]  ;;  %v986_v55 = vld [vmem:[%s1613_s16 + $0x10] sm:$0xff] }
 0x36c   :  { %v577_v34 = vmax.f32 %v574_v33, 0.0  ;;  %757 = vmatpush.bf16.msrb.mxu1 %v990_v51 }
 0x36d   :  { %v507_v60 = vunpack.c.l.b16 %v459_v56  ;;  %v468_v61 = vunpack.c.l.b16 %v458_v57  ;;  %v467_v62 = vunpack.c.l.b16 %v457_v58  ;;  %v508_v5 = vunpack.c.l.b16 %v460_v4  ;;  %v1017_v56 = vld [vmem:[#allocation15] ss:$0 sm:$0xff]  ;;  %v985_v57 = vld [vmem:[%s1613_s16 + $0x8] sm:$0xff] }
 0x36e   :  { %v628_v35 = vpack.c.bf16 %v577_v34, %v577_v34  ;;  %617 = vmatpush.bf16.msrb.mxu2 %v978_v37  ;;  %v1018_v34 = vld [vmem:[%s1615_s18] ss:$0 sm:$0xff] }
 0x36f   :  { %v890_v63 = vunpack.i.l.s16 %v507_v60  ;;  %v888_v1 = vunpack.i.l.s16 %v468_v61  ;;  %v887_v3 = vunpack.i.l.s16 %v467_v62  ;;  %v891_v8 = vunpack.i.l.s16 %v508_v5 }
 0x370   :  { %758 = vmatpush.bf16.msrb.mxu1 %v989_v52 }
 0x371   :  { %513 = vperm.xlu2 %1008, %v890_v63   ;;  %476 = vperm.xlu1 %1010, %v888_v1   ;;  %v984_v63 = vld [vmem:[%s1613_s16] sm:$0xff] }
 0x372   :  { %473 = vperm.xlu0 %1009, %v887_v3  }
 0x374   :  { %759 = vmatpush.bf16.msrb.mxu1 %v988_v53 }
 0x378   :  { %760 = vmatpush.bf16.msrb.mxu1 %v987_v54 }
 0x37a   :  { %516 = vperm.xlu0 %1009, %v891_v8  }
 0x37c   :  { %761 = vmatpush.bf16.msrb.mxu1 %v986_v55 }
 0x380   :  { %762 = vmatpush.bf16.msrb.mxu1 %v985_v57 }
 0x384   :  { %763 = vmatpush.bf16.msrb.mxu1 %v984_v63 }
 0x3cb   :  { %v514_v15 = vpop.permute.xlu2 %513 }
 0x3cc   :  { %v518_v29 = vperm.slane %v514_v15, %v1519_v0 }
 0x3e3   :  { %v477_v21 = vpop.permute.xlu1 %476 }
 0x3e4   :  { %v479_v6 = vperm.slane %v477_v21, %v1522_v2  ;;  %v474_v22 = vpop.permute.xlu0 %473 }
 0x3e5   :  { %v478_v7 = vperm.slane %v474_v22, %v1519_v0  ;;  %v982_v0 = vld [vmem:[#allocation18] sm:$0xff] }
 0x3e7   :  { %v480_v23 = vsel %vm391_vm1, %v479_v6, %v478_v7  ;;  %v993_v7 = vld [vmem:[%s1614_s17 + $0x8] sm:$0xff] }
 0x3e8   :  { %v481_v25 = vpack.c.b16 %v480_v23, %v480_v23  ;;  %829 = vmatpush.bf16.msra.mxu2 %v993_v7  ;;  %v992_v23 = vld [vmem:[%s1614_s17] sm:$0xff] }
 0x3ea   :  { %889 = vmatmul.msk.bf16.vlgmr.msra.gmra.mxu3 %vm488_vm4, %v481_v25 }
 0x3eb   :  { %650 = vmatpush.bf16.msra.mxu3 %v981_v24 }
 0x3ec   :  { %v517_v26 = vpop.permute.xlu0 %516  ;;  %830 = vmatpush.bf16.msra.mxu2 %v992_v23 }
 0x3ed   :  { %v519_v27 = vperm.slane %v517_v26, %v1522_v2  ;;  %v983_v2 = vld [vmem:[#allocation18 + $0x8] sm:$0xff] }
 0x3ee   :  { %683 = vmatpush.bf16.msra.mxu0 %v983_v2 }
 0x3ef   :  { %651 = vmatpush.bf16.msra.mxu3 %v980_v14  ;;  %v520_v30 = vsel %vm391_vm1, %v519_v27, %v518_v29 }
 0x3f0   :  { %v521_v31 = vpack.c.b16 %v520_v30, %v520_v30 }
 0x3f2   :  { %684 = vmatpush.bf16.msra.mxu0 %v982_v0 }
 0x3fa   :  { %892 = vmatmul.msk.bf16.vlgmr.msrb.gmra.mxu3 %vm488_vm4, %v521_v31 }
 0x40a   :  { %919 = vmatmul.msk.bf16.vlgmr.msra.gmra.mxu3 %vm234_vm0, %v628_v35 }
 0x46d   :  { %v501_v38 = vpop.f32.mrf.mxu3 }
 0x46e   :  { %v582_v41 = vpack.c.bf16 %v501_v38, %v501_v38 }
 0x470   :  { %v590_v44 = vunpack.c.l.b16 %v582_v41 }
 0x475   :  { %v503_v39 = vpop.f32.mrf.mxu3 }
 0x47d   :  { %v540_v40 = vpop.f32.mrf.mxu3 }
 0x47e   :  { %v583_v42 = vpack.c.bf16 %v540_v40, %v540_v40 }
 0x480   :  { %v591_v43 = vunpack.c.l.b16 %v583_v42 }
 0x482   :  { %v592_v28 = vrot.slane %v591_v43, 7 }
 0x484   :  { %v593_v45 = vsel %vm396_vm2, %v592_v28, %v590_v44 }
 0x485   :  { %v594_v46 = vpack.c.b16 %v593_v45, %v593_v45  ;;  %v542_v47 = vpop.f32.mrf.mxu3 }
 0x487   :  { %910 = vmatmul.msk.bf16.vlgmr.msrb.gmra.mxu2 %vm234_vm0, %v594_v46 }
 0x48d   :  { %v653_v48 = vpop.f32.mrf.mxu3 }
 0x495   :  { %v655_v49 = vpop.f32.mrf.mxu3 }
 0x50a   :  { %v619_v58 = vpop.f32.mrf.mxu2 }
 0x50b   :  { %v620_v59 = vadd.f32 %v1017_v56, %v619_v58 }
 0x50d   :  { %v623_v60 = vmax.f32 %v620_v59, 0.0 }
 0x50f   :  { %v661_v61 = vpack.c.bf16 %v623_v60, %v623_v60 }
 0x511   :  { %928 = vmatmul.msk.bf16.vlgmr.msra.gmra.mxu0 %vm234_vm0, %v661_v61 }
 0x512   :  { %v621_v62 = vpop.f32.mrf.mxu2 }
 0x58e   :  { %v686_v1 = vpop.f32.mrf.mxu0 }
 0x58f   :  { %v690_v3 = vmul.f32 %v686_v1, %v653_v48 }
 0x591   :  { %v707_v4 = vpack.c.bf16 %v690_v3, %v690_v3 }
 0x593   :  { %764 = vmatmul.bf16.vlgmr.msrb.gmra.mxu1 %v707_v4 }
 0x596   :  { %v688_v5 = vpop.f32.mrf.mxu0 }
 0x610   :  { %v765_v8 = vpop.f32.mrf.mxu1 }
 0x611   :  { %v769_v9 = vand.u32 2147483647, %v765_v8 }
 0x613   :  { %v770_v10 = vadd.f32 1e-06, %v769_v9 }
 0x615   :  { %1031 = vrsqrt.f32 %v770_v10  ;;  %vm777_vm6 = vweird.f32 %v770_v10 }
 0x618   :  { %v767_v11 = vpop.f32.mrf.mxu1 }
 0x61b   :  { %v1032_v12 = vpop.eup %1031 }
 0x61c   :  { %v772_v13 = vmul.f32 %v1032_v12, %v770_v10  ;;  %vm778_vm5 = vweird.f32 %v1032_v12 }
 0x61d   :  { %vm779_vm7 = vmor %vm777_vm6, %vm778_vm5 }
 0x61e   :  { %v773_v16 = vmul.f32 %v1032_v12, %v772_v13 }
 0x620   :  { %v774_v17 = vmul.f32 0.5, %v773_v16 }
 0x622   :  { %v775_v18 = vsub.f32 1.5, %v774_v17 }
 0x624   :  { %v776_v19 = vmul.f32 %v1032_v12, %v775_v18 }
 0x626   :  { %v780_v20 = vsel %vm779_vm7, %v1032_v12, %v776_v19 }
 0x627   :  { %v781_v21 = vmul.f32 %v780_v20, %v765_v8 }
 0x629   :  { %v782_v6 = vmul.f32 %v781_v21, %v781_v21 }
 0x62b   :  { %v784_v22 = vsel %vm783_vm8, %v782_v6, 0.0 }
 0x62c   :  { %785 = vadd.xlane.f32.xlu1 %v784_v22 }
 0x69f   :  { %v786_v24 = vpop.xlane.xlu1 %785 }
 0x6a0   :  { %v787_v25 = vadd.f32 1e-06, %v786_v24 }
 0x6a2   :  { %1033 = vrsqrt.f32 %v787_v25  ;;  %vm794_vm10 = vweird.f32 %v787_v25 }
 0x6a8   :  { %v1034_v14 = vpop.eup %1033 }
 0x6a9   :  { %v789_v26 = vmul.f32 %v1034_v14, %v787_v25  ;;  %vm795_vm9 = vweird.f32 %v1034_v14 }
 0x6aa   :  { %vm796_vm11 = vmor %vm794_vm10, %vm795_vm9 }
 0x6ab   :  { %v790_v15 = vmul.f32 %v1034_v14, %v789_v26 }
 0x6ad   :  { %v791_v27 = vmul.f32 0.5, %v790_v15 }
 0x6af   :  { %v792_v29 = vsub.f32 1.5, %v791_v27 }
 0x6b1   :  { %v793_v30 = vmul.f32 %v1034_v14, %v792_v29 }
 0x6b3   :  { %v797_v31 = vsel %vm796_vm11, %v1034_v14, %v793_v30 }
 0x6b4   :  { %v798_v32 = vmul.f32 %v797_v31, %v781_v21 }
 0x6b6   :  { %v803_v33 = vpack.c.bf16 %v798_v32, %v798_v32 }
 0x6b8   :  { %969 = vmatmul.msk.bf16.vlgmr.msra.gmra.mxu2 %vm234_vm0, %v803_v33 }
 0x73b   :  { %v832_v35 = vpop.f32.mrf.mxu2 }
 0x73c   :  { %v833_v36 = vadd.f32 %v1018_v34, %v832_v35 }
 0x73e   :  { %836 = vst.msk [vmem:[#allocation20] sm:$0x3] %vm399_vm3, %v833_v36 }
 0x73f   :  { %847 = dma.vmem_to_hbm [thread:$0]  %s843_s12, 32, %s845_s27, [#allocation5]  }
 0x743   :  { %v834_v37 = vpop.f32.mrf.mxu2 }
 0x744   :  { %1311 = dma.done.wait [#allocation5], 32  }
 0x745   :  { %1312 = vsyncadd [#allocation5], 4294967264 }
 0x746   :  { %852 = vsyncpa [#allocation4], 1 }
 0x747   :  { %853 = vsyncpa [#allocation7], 1 }
 0x748   :  { %854 = vsyncpa [#allocation10], 1 }
 0x749   :  { %855 = vsyncpa [#allocation13], 1 }
 0x74a   :  { %856 = vsyncpa [#allocation16], 1 }
 0x74b   :  { %857 = vsyncpa [#allocation19], 1 }
 0x74c   :  { %858 = vsyncpa [#allocation5], 1 }

</bundles_post_ra>
